<compile_context>
chip_gen: v7x
topology: tpu7x:2x2x1
jax: 0.10.0
libtpu: 0.0.40
codegen_flags: <defaults>
</compile_context>

<pallas_src>
import jax
import jax.numpy as jnp
from jax.experimental import pallas as pl
from jax.experimental.pallas import tpu as pltpu

BN_EPS = 1e-5
K = 240          # conv kernel width == contraction dim
OC = 240         # conv output channels (also the kernel's output lane width)
TM_MAX = 512     # row-tile size


def _matmul_bias_kernel(x_ref, w_ref, b_ref, o_ref):
    """o = x @ W' + b'   (BN already folded into W'/b' by the wrapper)."""
    o_ref[...] = (
        jnp.dot(x_ref[...], w_ref[...], preferred_element_type=jnp.float32)
        + b_ref[...]
    )


def _row_tiling(m: int):
    """Pick a row-tile size and padded row count satisfying the (8,128) constraint."""
    m8 = ((m + 7) // 8) * 8                 # sublane multiple
    tm = min(TM_MAX, m8)
    m_pad = ((m8 + tm - 1) // tm) * tm      # multiple of the tile size
    return tm, m_pad


@jax.jit
def sample_net_conv_forward(x, conv_w, conv_b, bn_gamma, bn_beta):
    """x: (N, 1, 24000) float32 — the (N, C=1, L) BatchNorm1d input of the module."""
    n = x.shape[0]
    m = n * 100
    x2d = x.reshape(m, K).astype(jnp.float32)           # rows of x.view(-1, 100, 240)

    # --- BatchNorm1d(1), training mode: batch stats over every element (one pass) -----
    mean = jnp.mean(x2d)
    mean_sq = jnp.mean(jnp.square(x2d))
    var = mean_sq - mean * mean                         # biased variance (PyTorch norm.)
    gamma = jnp.asarray(bn_gamma, jnp.float32).reshape(())
    beta = jnp.asarray(bn_beta, jnp.float32).reshape(())
    s = gamma * jax.lax.rsqrt(var + BN_EPS)
    t = beta - s * mean

    # --- Fold BN into conv weight / bias -----------------------------------------------
    w_t = conv_w.reshape(OC, K).astype(jnp.float32).T   # (K, OC); conv weight is (OC,1,1,K)
    w_fold = s * w_t                                    # (K, OC)
    b_fold = (t * jnp.sum(w_t, axis=0) + conv_b.astype(jnp.float32)).reshape(1, OC)

    # Pad M to a multiple of the row tile (zero rows; sliced away afterwards).
    tm, m_pad = _row_tiling(m)
    if m_pad != m:
        x2d = jnp.pad(x2d, ((0, m_pad - m), (0, 0)))

    out = pl.pallas_call(
        _matmul_bias_kernel,
        out_shape=jax.ShapeDtypeStruct((m_pad, OC), jnp.float32),
        grid=(m_pad // tm,),
        in_specs=[
            pl.BlockSpec((tm, K), lambda i: (i, 0)),     # x row tile (streams over M)
            pl.BlockSpec((K, OC), lambda i: (0, 0)),     # folded weights (VMEM-resident)
            pl.BlockSpec((1, OC), lambda i: (0, 0)),     # folded bias row (VMEM-resident)
        ],
        out_specs=pl.BlockSpec((tm, OC), lambda i: (i, 0)),
        compiler_params=pltpu.CompilerParams(
            dimension_semantics=("parallel",),           # shard row tiles across TCs
        ),
    )(x2d, w_fold, b_fold)

    # (M, 240) -> (N, 100, 240) == PyTorch output after squeeze(-1).permute(0, 2, 1)
    if m_pad != m:
        out = out[:m]
    return out.reshape(n, 100, OC)


def _reference(x, conv_w, conv_b, bn_gamma, bn_beta):
    """Pure-JAX reference of the PyTorch forward (training-mode BN)."""
    mean = jnp.mean(x)
    var = jnp.mean((x - mean) ** 2)
    x_bn = (x - mean) / jnp.sqrt(var + BN_EPS) * bn_gamma + bn_beta
    y = x_bn.reshape(-1, 100, 240)                      # (N, 100, 240)
    w = conv_w.reshape(240, 240)                        # (OC, K)
    return jnp.einsum("bhk,ok->bho", y, w) + conv_b     # == conv.squeeze(-1).permute(0,2,1)


if __name__ == "__main__":
    key = jax.random.PRNGKey(0)
    k_x, k_w, k_b = jax.random.split(key, 3)

    N = 2                                               # batch
    L = 100 * 240                                       # length so x.view(-1, 100, 240) works
    x = jax.random.normal(k_x, (N, 1, L), dtype=jnp.float32)

    # Deterministic parameter init mimicking PyTorch defaults:
    #   Conv2d: uniform(-1/sqrt(fan_in), +1/sqrt(fan_in)) with fan_in = 1*1*240
    #   BatchNorm1d: weight=1, bias=0
    fan_in = 1 * 1 * 240
    bound = 1.0 / (fan_in ** 0.5)
    conv_w = jax.random.uniform(
        k_w, (240, 1, 1, 240), minval=-bound, maxval=bound, dtype=jnp.float32
    )
    conv_b = jax.random.uniform(
        k_b, (240,), minval=-bound, maxval=bound, dtype=jnp.float32
    )
    bn_gamma = jnp.float32(1.0)
    bn_beta = jnp.float32(0.0)

    out = sample_net_conv_forward(x, conv_w, conv_b, bn_gamma, bn_beta)
    jax.block_until_ready(out)

    ref = _reference(x, conv_w, conv_b, bn_gamma, bn_beta)
    assert out.shape == (N, 100, 240), out.shape
    max_err = float(jnp.max(jnp.abs(out - ref)))
    assert jnp.allclose(out, ref, atol=2e-3, rtol=2e-3), f"max abs err = {max_err}"
    print("KERNEL_OK")
</pallas_src>

<mosaic_0001>
module attributes {stable_mosaic.version = 11 : i64} {
  func.func @_matmul_bias_kernel(%arg0: i32, %arg1: memref<200x240xf32, #tpu.memory_space<vmem>>, %arg2: memref<240x240xf32, #tpu.memory_space<vmem>>, %arg3: memref<1x240xf32, #tpu.memory_space<vmem>>, %arg4: memref<200x240xf32, #tpu.memory_space<vmem>>) attributes {dimension_semantics = [#tpu.dimension_semantics<parallel>], iteration_bounds = array<i64: 1>, scalar_prefetch = 0 : i64, scratch_operands = 0 : i64, tpu.core_type = #tpu.core_type<tc>, window_params = [{transform_indices = @transform_0, window_bounds = array<i64: 200, 240>}, {pipeline_mode = #tpu.pipeline_mode<synchronous>, transform_indices = @transform_1, window_bounds = array<i64: 240, 240>}, {pipeline_mode = #tpu.pipeline_mode<synchronous>, transform_indices = @transform_2, window_bounds = array<i64: 1, 240>}, {transform_indices = @transform_3, window_bounds = array<i64: 200, 240>}]} {
    %c0 = arith.constant 0 : index
    %c0_0 = arith.constant 0 : index
    %0 = vector.load %arg1[%c0, %c0_0] : memref<200x240xf32, #tpu.memory_space<vmem>>, vector<200x240xf32>
    %c0_1 = arith.constant 0 : index
    %c0_2 = arith.constant 0 : index
    %1 = vector.load %arg2[%c0_1, %c0_2] : memref<240x240xf32, #tpu.memory_space<vmem>>, vector<240x240xf32>
    %cst = arith.constant dense<0.000000e+00> : vector<200x240xf32>
    %2 = tpu.matmul %0, %1, %cst {dimension_numbers = #tpu.dot_dimension_numbers<[1], [0], [0], [1], [0, 0, 1, 1], [], []>} : vector<200x240xf32>, vector<240x240xf32>, vector<200x240xf32> -> vector<200x240xf32>
    %c0_3 = arith.constant 0 : index
    %c0_4 = arith.constant 0 : index
    %3 = vector.load %arg3[%c0_3, %c0_4] : memref<1x240xf32, #tpu.memory_space<vmem>>, vector<1x240xf32>
    %4 = vector.broadcast %3 : vector<1x240xf32> to vector<200x240xf32>
    %5 = arith.addf %2, %4 : vector<200x240xf32>
    %c0_5 = arith.constant 0 : index
    %c0_6 = arith.constant 0 : index
    %6 = vector.load %arg4[%c0_5, %c0_6] : memref<200x240xf32, #tpu.memory_space<vmem>>, vector<200x240xf32>
    tpu.vector_store %arg4[%c0_5, %c0_6], %5 {strides = array<i32>} : memref<200x240xf32, #tpu.memory_space<vmem>>, vector<200x240xf32>,
    return
  }
  func.func @transform_0(%arg0: i32) -> (i32, i32) {
    %c0_i32 = arith.constant 0 : i32
    %c0_i32_0 = arith.constant 0 : i32
    return %arg0, %c0_i32 : i32, i32
  }
  func.func @transform_1(%arg0: i32) -> (i32, i32) {
    %c0_i32 = arith.constant 0 : i32
    %c0_i32_0 = arith.constant 0 : i32
    %c0_i32_1 = arith.constant 0 : i32
    return %c0_i32, %c0_i32_0 : i32, i32
  }
  func.func @transform_2(%arg0: i32) -> (i32, i32) {
    %c0_i32 = arith.constant 0 : i32
    %c0_i32_0 = arith.constant 0 : i32
    %c0_i32_1 = arith.constant 0 : i32
    return %c0_i32, %c0_i32_0 : i32, i32
  }
  func.func @transform_3(%arg0: i32) -> (i32, i32) {
    %c0_i32 = arith.constant 0 : i32
    %c0_i32_0 = arith.constant 0 : i32
    return %arg0, %c0_i32 : i32, i32
  }
}

</mosaic_0001>

<bundles_post_ra>
// kernel: sample_net_conv_forward.1
= control target key start
LH: loop header
LB: loop body
LE: loop exit
PB: predicated region body
PF: predicated region fallthrough
CT: control target
= control target key end

     0   :  { %vm136_vm0 = vcmask 916480   ;;  %s1203_s1 = inlined_call_operand.vmem [shape: f32[240,240], index: 1, kind: input, shape index: {}]   ;;  %s1204_s0 = inlined_call_operand.vmem [shape: f32[200,240], index: 0, kind: input, shape index: {}]   ;;  %s1205_s2 = inlined_call_operand.vmem [shape: f32[1,240], index: 2, kind: input, shape index: {}]   ;;  %s1206_s3 = inlined_call_operand.vmem [shape: f32[200,240], index: 3, kind: output, shape index: {}]  }
   0x1   :  { %v65_v0 = vld [vmem:[%s1203_s1 + $0x8] sm:$0xff]  ;;  %v67_v1 = vld [vmem:[%s1203_s1 + $0x18] sm:$0xff]  ;;  %v64_v2 = vld [vmem:[%s1203_s1] sm:$0xff] }
   0x2   :  { %v506_v3 = vpack.c.bf16 %v67_v1, %v65_v0  ;;  %v66_v4 = vld [vmem:[%s1203_s1 + $0x10] sm:$0xff]  ;;  %v69_v5 = vld [vmem:[%s1203_s1 + $0x28] sm:$0xff]  ;;  %v71_v6 = vld [vmem:[%s1203_s1 + $0x38] sm:$0xff] }
   0x3   :  { %v508_v7 = vpack.c.bf16 %v66_v4, %v64_v2  ;;  %v510_v8 = vpack.c.bf16 %v71_v6, %v69_v5  ;;  %v68_v9 = vld [vmem:[%s1203_s1 + $0x20] sm:$0xff]  ;;  %v70_v10 = vld [vmem:[%s1203_s1 + $0x30] sm:$0xff]  ;;  %v73_v11 = vld [vmem:[%s1203_s1 + $0x48] sm:$0xff] }
   0x4   :  { %507 = vmatprep.subr.bf16.mxu0 %v506_v3  ;;  %566 = vmatprep.subr.bf16.mxu1 %v506_v3  ;;  %v75_v12 = vld [vmem:[%s1203_s1 + $0x58] sm:$0xff]  ;;  %v512_v13 = vpack.c.bf16 %v70_v10, %v68_v9  ;;  %v72_v15 = vld [vmem:[%s1203_s1 + $0x40] sm:$0xff]  ;;  %v74_v16 = vld [vmem:[%s1203_s1 + $0x50] sm:$0xff] }
   0x5   :  { %509 = vmatpush1.bf16.msra.mxu0 %v508_v7  ;;  %581 = vmatpush1.bf16.msra.mxu1 %v508_v7  ;;  %v514_v14 = vpack.c.bf16 %v75_v12, %v73_v11  ;;  %v77_v17 = vld [vmem:[%s1203_s1 + $0x68] sm:$0xff]  ;;  %v79_v18 = vld [vmem:[%s1203_s1 + $0x78] sm:$0xff]  ;;  %v516_v19 = vpack.c.bf16 %v74_v16, %v72_v15  ;;  %v76_v21 = vld [vmem:[%s1203_s1 + $0x60] sm:$0xff] }
   0x6   :  { %511 = vmatprep.subr.bf16.mxu0 %v510_v8  ;;  %567 = vmatprep.subr.bf16.mxu1 %v510_v8  ;;  %v518_v20 = vpack.c.bf16 %v79_v18, %v77_v17  ;;  %v78_v22 = vld [vmem:[%s1203_s1 + $0x70] sm:$0xff]  ;;  %v81_v23 = vld [vmem:[%s1203_s1 + $0x88] sm:$0xff]  ;;  %v83_v24 = vld [vmem:[%s1203_s1 + $0x98] sm:$0xff] }
   0x7   :  { %v520_v25 = vpack.c.bf16 %v78_v22, %v76_v21  ;;  %v522_v26 = vpack.c.bf16 %v83_v24, %v81_v23  ;;  %v80_v27 = vld [vmem:[%s1203_s1 + $0x80] sm:$0xff]  ;;  %v82_v28 = vld [vmem:[%s1203_s1 + $0x90] sm:$0xff]  ;;  %v85_v29 = vld [vmem:[%s1203_s1 + $0xa8] sm:$0xff] }
   0x8   :  { %v87_v30 = vld [vmem:[%s1203_s1 + $0xb8] sm:$0xff]  ;;  %v524_v31 = vpack.c.bf16 %v82_v28, %v80_v27  ;;  %v84_v33 = vld [vmem:[%s1203_s1 + $0xa0] sm:$0xff]  ;;  %v86_v34 = vld [vmem:[%s1203_s1 + $0xb0] sm:$0xff] }
   0x9   :  { %513 = vmatpush1.bf16.msra.mxu0 %v512_v13  ;;  %582 = vmatpush1.bf16.msra.mxu1 %v512_v13  ;;  %v526_v32 = vpack.c.bf16 %v87_v30, %v85_v29  ;;  %v89_v35 = vld [vmem:[%s1203_s1 + $0xc8] sm:$0xff]  ;;  %v91_v36 = vld [vmem:[%s1203_s1 + $0xd8] sm:$0xff]  ;;  %v528_v37 = vpack.c.bf16 %v86_v34, %v84_v33  ;;  %v88_v41 = vld [vmem:[%s1203_s1 + $0xc0] sm:$0xff] }
   0xa   :  { %515 = vmatprep.subr.bf16.mxu0 %v514_v14  ;;  %568 = vmatprep.subr.bf16.mxu1 %v514_v14  ;;  %v15_v38 = vld [vmem:[%s1204_s0 + $0x8] sm:$0xff]  ;;  %v41_v39 = vld [vmem:[%s1204_s0 + $0xd8] sm:$0xff]  ;;  %v530_v40 = vpack.c.bf16 %v91_v36, %v89_v35  ;;  %v90_v42 = vld [vmem:[%s1203_s1 + $0xd0] sm:$0xff] }
   0xb   :  { %v93_v43 = vld [vmem:[%s1203_s1 + $0xe8] sm:$0xff]  ;;  %v95_v44 = vld [vmem:[%s1203_s1 + $0xf8] sm:$0xff]  ;;  %481 = vmatprep.mubr.msk.f32.mxu0 %vm136_vm0, %v15_v38  ;;  %494 = vmatprep.mubr.msk.f32.mxu1 %vm136_vm0, %v41_v39  ;;  %v532_v45 = vpack.c.bf16 %v90_v42, %v88_v41  ;;  %v92_v47 = vld [vmem:[%s1203_s1 + $0xe0] sm:$0xff] }
   0xc   :  { %v534_v46 = vpack.c.bf16 %v95_v44, %v93_v43  ;;  %v94_v48 = vld [vmem:[%s1203_s1 + $0xf0] sm:$0xff]  ;;  %v97_v49 = vld [vmem:[%s1203_s1 + $0x108] sm:$0xff]  ;;  %v99_v50 = vld [vmem:[%s1203_s1 + $0x118] sm:$0xff] }
   0xd   :  { %517 = vmatpush1.bf16.msra.mxu0 %v516_v19  ;;  %583 = vmatpush1.bf16.msra.mxu1 %v516_v19  ;;  %v536_v51 = vpack.c.bf16 %v94_v48, %v92_v47  ;;  %v538_v52 = vpack.c.bf16 %v99_v50, %v97_v49  ;;  %v96_v53 = vld [vmem:[%s1203_s1 + $0x100] sm:$0xff]  ;;  %v98_v54 = vld [vmem:[%s1203_s1 + $0x110] sm:$0xff]  ;;  %v101_v55 = vld [vmem:[%s1203_s1 + $0x128] sm:$0xff] }
   0xe   :  { %519 = vmatprep.subr.bf16.mxu0 %v518_v20  ;;  %569 = vmatprep.subr.bf16.mxu1 %v518_v20  ;;  %v103_v56 = vld [vmem:[%s1203_s1 + $0x138] sm:$0xff]  ;;  %v540_v57 = vpack.c.bf16 %v98_v54, %v96_v53  ;;  %v100_v59 = vld [vmem:[%s1203_s1 + $0x120] sm:$0xff]  ;;  %v102_v60 = vld [vmem:[%s1203_s1 + $0x130] sm:$0xff] }
   0xf   :  { %v542_v58 = vpack.c.bf16 %v103_v56, %v101_v55  ;;  %v105_v61 = vld [vmem:[%s1203_s1 + $0x148] sm:$0xff]  ;;  %v107_v62 = vld [vmem:[%s1203_s1 + $0x158] sm:$0xff]  ;;  %v544_v63 = vpack.c.bf16 %v102_v60, %v100_v59  ;;  %v104_v1 = vld [vmem:[%s1203_s1 + $0x140] sm:$0xff] }
  0x10   :  { %v546_v0 = vpack.c.bf16 %v107_v62, %v105_v61  ;;  %v106_v2 = vld [vmem:[%s1203_s1 + $0x150] sm:$0xff]  ;;  %v109_v3 = vld [vmem:[%s1203_s1 + $0x168] sm:$0xff]  ;;  %v111_v4 = vld [vmem:[%s1203_s1 + $0x178] sm:$0xff] }
  0x11   :  { %521 = vmatpush1.bf16.msra.mxu0 %v520_v25  ;;  %584 = vmatpush1.bf16.msra.mxu1 %v520_v25  ;;  %v548_v5 = vpack.c.bf16 %v106_v2, %v104_v1  ;;  %v550_v6 = vpack.c.bf16 %v111_v4, %v109_v3  ;;  %v108_v7 = vld [vmem:[%s1203_s1 + $0x160] sm:$0xff]  ;;  %v110_v8 = vld [vmem:[%s1203_s1 + $0x170] sm:$0xff]  ;;  %v113_v9 = vld [vmem:[%s1203_s1 + $0x188] sm:$0xff] }
  0x12   :  { %523 = vmatprep.subr.bf16.mxu0 %v522_v26  ;;  %570 = vmatprep.subr.bf16.mxu1 %v522_v26  ;;  %v115_v10 = vld [vmem:[%s1203_s1 + $0x198] sm:$0xff]  ;;  %v552_v11 = vpack.c.bf16 %v110_v8, %v108_v7  ;;  %v112_v13 = vld [vmem:[%s1203_s1 + $0x180] sm:$0xff]  ;;  %v114_v14 = vld [vmem:[%s1203_s1 + $0x190] sm:$0xff] }
  0x13   :  { %v554_v12 = vpack.c.bf16 %v115_v10, %v113_v9  ;;  %v117_v15 = vld [vmem:[%s1203_s1 + $0x1a8] sm:$0xff]  ;;  %v119_v16 = vld [vmem:[%s1203_s1 + $0x1b8] sm:$0xff]  ;;  %v556_v17 = vpack.c.bf16 %v114_v14, %v112_v13  ;;  %v116_v19 = vld [vmem:[%s1203_s1 + $0x1a0] sm:$0xff] }
  0x14   :  { %v558_v18 = vpack.c.bf16 %v119_v16, %v117_v15  ;;  %v118_v20 = vld [vmem:[%s1203_s1 + $0x1b0] sm:$0xff]  ;;  %v121_v21 = vld [vmem:[%s1203_s1 + $0x1c8] sm:$0xff]  ;;  %v123_v22 = vld [vmem:[%s1203_s1 + $0x1d8] sm:$0xff] }
  0x15   :  { %525 = vmatpush1.bf16.msra.mxu0 %v524_v31  ;;  %585 = vmatpush1.bf16.msra.mxu1 %v524_v31  ;;  %v560_v23 = vpack.c.bf16 %v118_v20, %v116_v19  ;;  %v562_v24 = vpack.c.bf16 %v123_v22, %v121_v21  ;;  %v120_v25 = vld [vmem:[%s1203_s1 + $0x1c0] sm:$0xff]  ;;  %v122_v26 = vld [vmem:[%s1203_s1 + $0x1d0] sm:$0xff]  ;;  %v17_v30 = vld [vmem:[%s1204_s0 + $0x18] sm:$0xff] }
  0x16   :  { %527 = vmatprep.subr.bf16.mxu0 %v526_v32  ;;  %571 = vmatprep.subr.bf16.mxu1 %v526_v32  ;;  %v564_v27 = vpack.c.bf16 %v122_v26, %v120_v25  ;;  %v14_v28 = vld [vmem:[%s1204_s0] sm:$0xff]  ;;  %v40_v29 = vld [vmem:[%s1204_s0 + $0xd0] sm:$0xff]  ;;  %v43_v31 = vld [vmem:[%s1204_s0 + $0xe8] sm:$0xff] }
  0x17   :  { %v16_v32 = vld [vmem:[%s1204_s0 + $0x10] sm:$0xff]  ;;  %v42_v33 = vld [vmem:[%s1204_s0 + $0xe0] sm:$0xff]  ;;  %v19_v34 = vld [vmem:[%s1204_s0 + $0x28] sm:$0xff] }
  0x18   :  { %v45_v35 = vld [vmem:[%s1204_s0 + $0xf8] sm:$0xff]  ;;  %v18_v36 = vld [vmem:[%s1204_s0 + $0x20] sm:$0xff]  ;;  %v47_v39 = vld [vmem:[%s1204_s0 + $0x108] sm:$0xff] }
  0x19   :  { %529 = vmatpush1.bf16.msra.mxu0 %v528_v37  ;;  %586 = vmatpush1.bf16.msra.mxu1 %v528_v37  ;;  %v44_v37 = vld [vmem:[%s1204_s0 + $0xf0] sm:$0xff]  ;;  %v21_v38 = vld [vmem:[%s1204_s0 + $0x38] sm:$0xff]  ;;  %v46_v41 = vld [vmem:[%s1204_s0 + $0x100] sm:$0xff] }
  0x1a   :  { %531 = vmatprep.subr.bf16.mxu0 %v530_v40  ;;  %572 = vmatprep.subr.bf16.mxu1 %v530_v40  ;;  %v20_v40 = vld [vmem:[%s1204_s0 + $0x30] sm:$0xff]  ;;  %v23_v42 = vld [vmem:[%s1204_s0 + $0x48] sm:$0xff]  ;;  %v49_v43 = vld [vmem:[%s1204_s0 + $0x118] sm:$0xff] }
  0x1b   :  { %v22_v44 = vld [vmem:[%s1204_s0 + $0x40] sm:$0xff]  ;;  %v51_v47 = vld [vmem:[%s1204_s0 + $0x128] sm:$0xff]  ;;  %v24_v48 = vld [vmem:[%s1204_s0 + $0x50] sm:$0xff] }
  0x1c   :  { %v50_v49 = vld [vmem:[%s1204_s0 + $0x120] sm:$0xff]  ;;  %v27_v50 = vld [vmem:[%s1204_s0 + $0x68] sm:$0xff]  ;;  %v52_v53 = vld [vmem:[%s1204_s0 + $0x130] sm:$0xff] }
  0x1d   :  { %533 = vmatpush1.bf16.msra.mxu0 %v532_v45  ;;  %587 = vmatpush1.bf16.msra.mxu1 %v532_v45  ;;  %v48_v45 = vld [vmem:[%s1204_s0 + $0x110] sm:$0xff]  ;;  %v29_v54 = vld [vmem:[%s1204_s0 + $0x78] sm:$0xff]  ;;  %v55_v55 = vld [vmem:[%s1204_s0 + $0x148] sm:$0xff] }
  0x1e   :  { %535 = vmatprep.subr.bf16.mxu0 %v534_v46  ;;  %573 = vmatprep.subr.bf16.mxu1 %v534_v46  ;;  %v25_v46 = vld [vmem:[%s1204_s0 + $0x58] sm:$0xff]  ;;  %v28_v56 = vld [vmem:[%s1204_s0 + $0x70] sm:$0xff]  ;;  %v30_v60 = vld [vmem:[%s1204_s0 + $0x80] sm:$0xff] }
  0x1f   :  { %v57_v59 = vld [vmem:[%s1204_s0 + $0x158] sm:$0xff]  ;;  %v56_v61 = vld [vmem:[%s1204_s0 + $0x150] sm:$0xff]  ;;  %v58_v1 = vld [vmem:[%s1204_s0 + $0x160] sm:$0xff] }
  0x20   :  { %v33_v62 = vld [vmem:[%s1204_s0 + $0x98] sm:$0xff]  ;;  %v35_v2 = vld [vmem:[%s1204_s0 + $0xa8] sm:$0xff]  ;;  %v34_v4 = vld [vmem:[%s1204_s0 + $0xa0] sm:$0xff] }
  0x21   :  { %537 = vmatpush1.bf16.msra.mxu0 %v536_v51  ;;  %588 = vmatpush1.bf16.msra.mxu1 %v536_v51  ;;  %v53_v51 = vld [vmem:[%s1204_s0 + $0x138] sm:$0xff]  ;;  %v63_v7 = vld [vmem:[%s1204_s0 + $0x188] sm:$0xff]  ;;  %v36_v8 = vld [vmem:[%s1204_s0 + $0xb0] sm:$0xff] }
  0x22   :  { %539 = vmatprep.subr.bf16.mxu0 %v538_v52  ;;  %574 = vmatprep.subr.bf16.mxu1 %v538_v52  ;;  %v26_v52 = vld [vmem:[%s1204_s0 + $0x60] sm:$0xff]  ;;  %v61_v3 = vld [vmem:[%s1204_s0 + $0x178] sm:$0xff]  ;;  %v39_v10 = vld [vmem:[%s1204_s0 + $0xc8] sm:$0xff] }
  0x23   :  { %v62_v9 = vld [vmem:[%s1204_s0 + $0x180] sm:$0xff] }
  0x24   :  { %v124_v15 = vld [vmem:[%s1205_s2] sm:$0x3] }
  0x25   :  { %541 = vmatpush1.bf16.msra.mxu0 %v540_v57  ;;  %589 = vmatpush1.bf16.msra.mxu1 %v540_v57  ;;  %v54_v57 = vld [vmem:[%s1204_s0 + $0x140] sm:$0xff] }
  0x26   :  { %543 = vmatprep.subr.bf16.mxu0 %v542_v58  ;;  %575 = vmatprep.subr.bf16.mxu1 %v542_v58  ;;  %v31_v58 = vld [vmem:[%s1204_s0 + $0x88] sm:$0xff] }
  0x29   :  { %545 = vmatpush1.bf16.msra.mxu0 %v544_v63  ;;  %590 = vmatpush1.bf16.msra.mxu1 %v544_v63  ;;  %v59_v63 = vld [vmem:[%s1204_s0 + $0x168] sm:$0xff] }
  0x2a   :  { %547 = vmatprep.subr.bf16.mxu0 %v546_v0  ;;  %576 = vmatprep.subr.bf16.mxu1 %v546_v0  ;;  %v32_v0 = vld [vmem:[%s1204_s0 + $0x90] sm:$0xff] }
  0x2d   :  { %549 = vmatpush1.bf16.msra.mxu0 %v548_v5  ;;  %591 = vmatpush1.bf16.msra.mxu1 %v548_v5  ;;  %v60_v5 = vld [vmem:[%s1204_s0 + $0x170] sm:$0xff] }
  0x2e   :  { %551 = vmatprep.subr.bf16.mxu0 %v550_v6  ;;  %577 = vmatprep.subr.bf16.mxu1 %v550_v6  ;;  %v37_v6 = vld [vmem:[%s1204_s0 + $0xb8] sm:$0xff] }
  0x31   :  { %553 = vmatpush1.bf16.msra.mxu0 %v552_v11  ;;  %592 = vmatpush1.bf16.msra.mxu1 %v552_v11  ;;  %v38_v11 = vld [vmem:[%s1204_s0 + $0xc0] sm:$0xff] }
  0x32   :  { %555 = vmatprep.subr.bf16.mxu0 %v554_v12  ;;  %578 = vmatprep.subr.bf16.mxu1 %v554_v12  ;;  %v126_v12 = vlaneseq }
  0x34   :  { %v127_v13 = vshrl.u32 %v126_v12, 7 }
  0x35   :  { %557 = vmatpush1.bf16.msra.mxu0 %v556_v17  ;;  %593 = vmatpush1.bf16.msra.mxu1 %v556_v17 }
  0x36   :  { %559 = vmatprep.subr.bf16.mxu0 %v558_v18  ;;  %579 = vmatprep.subr.bf16.mxu1 %v558_v18  ;;  %v128_v14 = vsub.s32 0, %v127_v13  ;;  %v132_v16 = vsub.s32 1, %v127_v13 }
  0x38   :  { %v974_v17 = vrot.slane %v124_v15, %v128_v14  ;;  %v976_v18 = vrot.slane %v124_v15, %v132_v16 }
  0x39   :  { %561 = vmatpush1.bf16.msra.mxu0 %v560_v23  ;;  %594 = vmatpush1.bf16.msra.mxu1 %v560_v23 }
  0x3a   :  { %563 = vmatprep.subr.bf16.mxu0 %v562_v24  ;;  %580 = vmatprep.subr.bf16.mxu1 %v562_v24 }
  0x3d   :  { %565 = vmatpush1.bf16.msra.mxu0 %v564_v27  ;;  %595 = vmatpush1.bf16.msra.mxu1 %v564_v27 }
  0x40   :  { %277 = vmatmul.mubr.f32.vlgmr.msra.gmra.mrb[0].mxu0 %v14_v28  ;;  %355 = vmatmul.mubr.f32.vlgmr.msra.gmra.mrb[0].mxu1 %v40_v29 }
  0x41   :  { %482 = vmatprep.mubr.msk.f32.mxu0 %vm136_vm0, %v17_v30  ;;  %495 = vmatprep.mubr.msk.f32.mxu1 %vm136_vm0, %v43_v31 }
  0x44   :  { %283 = vmatmul.mubr.f32.gmra.mrb[2].mxu0 %v16_v32  ;;  %361 = vmatmul.mubr.f32.gmra.mrb[2].mxu1 %v42_v33 }
  0x45   :  { %483 = vmatprep.mubr.msk.f32.mxu0 %vm136_vm0, %v19_v34  ;;  %496 = vmatprep.mubr.msk.f32.mxu1 %vm136_vm0, %v45_v35 }
  0x48   :  { %289 = vmatmul.mubr.f32.gmra.mrb[4].mxu0 %v18_v36  ;;  %367 = vmatmul.mubr.f32.gmra.mrb[4].mxu1 %v44_v37 }
  0x49   :  { %484 = vmatprep.mubr.msk.f32.mxu0 %vm136_vm0, %v21_v38  ;;  %497 = vmatprep.mubr.msk.f32.mxu1 %vm136_vm0, %v47_v39 }
  0x4c   :  { %295 = vmatmul.mubr.f32.gmra.mrb[6].mxu0 %v20_v40  ;;  %373 = vmatmul.mubr.f32.gmra.mrb[6].mxu1 %v46_v41 }
  0x4d   :  { %485 = vmatprep.mubr.msk.f32.mxu0 %vm136_vm0, %v23_v42  ;;  %498 = vmatprep.mubr.msk.f32.mxu1 %vm136_vm0, %v49_v43 }
  0x50   :  { %301 = vmatmul.mubr.f32.gmra.mrb[8].mxu0 %v22_v44  ;;  %379 = vmatmul.mubr.f32.gmra.mrb[8].mxu1 %v48_v45 }
  0x51   :  { %486 = vmatprep.mubr.msk.f32.mxu0 %vm136_vm0, %v25_v46  ;;  %499 = vmatprep.mubr.msk.f32.mxu1 %vm136_vm0, %v51_v47 }
  0x54   :  { %307 = vmatmul.mubr.f32.gmra.mrb[10].mxu0 %v24_v48  ;;  %385 = vmatmul.mubr.f32.gmra.mrb[10].mxu1 %v50_v49 }
  0x55   :  { %487 = vmatprep.mubr.msk.f32.mxu0 %vm136_vm0, %v27_v50  ;;  %500 = vmatprep.mubr.msk.f32.mxu1 %vm136_vm0, %v53_v51 }
  0x58   :  { %313 = vmatmul.mubr.f32.gmra.mrb[12].mxu0 %v26_v52  ;;  %391 = vmatmul.mubr.f32.gmra.mrb[12].mxu1 %v52_v53 }
  0x59   :  { %488 = vmatprep.mubr.msk.f32.mxu0 %vm136_vm0, %v29_v54  ;;  %501 = vmatprep.mubr.msk.f32.mxu1 %vm136_vm0, %v55_v55 }
  0x5c   :  { %319 = vmatmul.mubr.f32.gmra.mrb[14].mxu0 %v28_v56  ;;  %397 = vmatmul.mubr.f32.gmra.mrb[14].mxu1 %v54_v57 }
  0x5d   :  { %489 = vmatprep.mubr.msk.f32.mxu0 %vm136_vm0, %v31_v58  ;;  %502 = vmatprep.mubr.msk.f32.mxu1 %vm136_vm0, %v57_v59 }
  0x60   :  { %325 = vmatmul.mubr.f32.gmra.mrb[16].mxu0 %v30_v60  ;;  %403 = vmatmul.mubr.f32.gmra.mrb[16].mxu1 %v56_v61 }
  0x61   :  { %490 = vmatprep.mubr.msk.f32.mxu0 %vm136_vm0, %v33_v62  ;;  %503 = vmatprep.mubr.msk.f32.mxu1 %vm136_vm0, %v59_v63 }
  0x64   :  { %331 = vmatmul.mubr.f32.gmra.mrb[18].mxu0 %v32_v0  ;;  %409 = vmatmul.mubr.f32.gmra.mrb[18].mxu1 %v58_v1 }
  0x65   :  { %491 = vmatprep.mubr.msk.f32.mxu0 %vm136_vm0, %v35_v2  ;;  %504 = vmatprep.mubr.msk.f32.mxu1 %vm136_vm0, %v61_v3 }
  0x68   :  { %337 = vmatmul.mubr.f32.gmra.mrb[20].mxu0 %v34_v4  ;;  %415 = vmatmul.mubr.f32.gmra.mrb[20].mxu1 %v60_v5 }
  0x69   :  { %492 = vmatprep.mubr.msk.f32.mxu0 %vm136_vm0, %v37_v6  ;;  %505 = vmatprep.mubr.msk.f32.mxu1 %vm136_vm0, %v63_v7 }
  0x6c   :  { %343 = vmatmul.mubr.f32.gmra.mrb[22].mxu0 %v36_v8  ;;  %421 = vmatmul.mubr.f32.gmra.mrb[22].mxu1 %v62_v9 }
  0x6d   :  { %493 = vmatprep.mubr.msk.f32.mxu0 %vm136_vm0, %v39_v10 }
  0x70   :  { %349 = vmatmul.mubr.f32.gmra.mrb[24].mxu0 %v38_v11 }
 0x113   :  { %v278_v19 = vpop.f32.mrb[0].mxu0  ;;  %v356_v20 = vpop.f32.mrb[0].mxu1 }
 0x114   :  { %v279_v21 = vadd.f32 %v278_v19, %v974_v17  ;;  %v280_v22 = vpop.f32.mrb[1].mxu0  ;;  %v357_v23 = vadd.f32 %v356_v20, %v974_v17  ;;  %v358_v24 = vpop.f32.mrb[1].mxu1 }
 0x115   :  { %v281_v25 = vadd.f32 %v280_v22, %v976_v18  ;;  %v359_v26 = vadd.f32 %v358_v24, %v976_v18 }
 0x116   :  { %427 = vst [vmem:[%s1206_s3] sm:$0xff] %v279_v21  ;;  %453 = vst [vmem:[%s1206_s3 + $0xd0] sm:$0xff] %v357_v23 }
 0x117   :  { %428 = vst.msk [vmem:[%s1206_s3 + $0x8] sm:$0xff] %vm136_vm0, %v281_v25  ;;  %v284_v27 = vpop.f32.mrb[2].mxu0  ;;  %454 = vst.msk [vmem:[%s1206_s3 + $0xd8] sm:$0xff] %vm136_vm0, %v359_v26  ;;  %v362_v28 = vpop.f32.mrb[2].mxu1 }
 0x118   :  { %v285_v29 = vadd.f32 %v284_v27, %v974_v17  ;;  %v286_v30 = vpop.f32.mrb[3].mxu0  ;;  %v363_v31 = vadd.f32 %v362_v28, %v974_v17  ;;  %v364_v32 = vpop.f32.mrb[3].mxu1 }
 0x119   :  { %v287_v33 = vadd.f32 %v286_v30, %v976_v18  ;;  %v365_v34 = vadd.f32 %v364_v32, %v976_v18 }
 0x11a   :  { %429 = vst [vmem:[%s1206_s3 + $0x10] sm:$0xff] %v285_v29  ;;  %455 = vst [vmem:[%s1206_s3 + $0xe0] sm:$0xff] %v363_v31 }
 0x11b   :  { %430 = vst.msk [vmem:[%s1206_s3 + $0x18] sm:$0xff] %vm136_vm0, %v287_v33  ;;  %v290_v35 = vpop.f32.mrb[4].mxu0  ;;  %456 = vst.msk [vmem:[%s1206_s3 + $0xe8] sm:$0xff] %vm136_vm0, %v365_v34  ;;  %v368_v36 = vpop.f32.mrb[4].mxu1 }
 0x11c   :  { %v291_v37 = vadd.f32 %v290_v35, %v974_v17  ;;  %v292_v38 = vpop.f32.mrb[5].mxu0  ;;  %v369_v39 = vadd.f32 %v368_v36, %v974_v17  ;;  %v370_v40 = vpop.f32.mrb[5].mxu1 }
 0x11d   :  { %v293_v41 = vadd.f32 %v292_v38, %v976_v18  ;;  %v371_v42 = vadd.f32 %v370_v40, %v976_v18 }
 0x11e   :  { %431 = vst [vmem:[%s1206_s3 + $0x20] sm:$0xff] %v291_v37  ;;  %457 = vst [vmem:[%s1206_s3 + $0xf0] sm:$0xff] %v369_v39 }
 0x11f   :  { %432 = vst.msk [vmem:[%s1206_s3 + $0x28] sm:$0xff] %vm136_vm0, %v293_v41  ;;  %v296_v43 = vpop.f32.mrb[6].mxu0  ;;  %458 = vst.msk [vmem:[%s1206_s3 + $0xf8] sm:$0xff] %vm136_vm0, %v371_v42  ;;  %v374_v44 = vpop.f32.mrb[6].mxu1 }
 0x120   :  { %v297_v45 = vadd.f32 %v296_v43, %v974_v17  ;;  %v298_v46 = vpop.f32.mrb[7].mxu0  ;;  %v375_v47 = vadd.f32 %v374_v44, %v974_v17  ;;  %v376_v48 = vpop.f32.mrb[7].mxu1 }
 0x121   :  { %v299_v49 = vadd.f32 %v298_v46, %v976_v18  ;;  %v377_v50 = vadd.f32 %v376_v48, %v976_v18 }
 0x122   :  { %433 = vst [vmem:[%s1206_s3 + $0x30] sm:$0xff] %v297_v45  ;;  %459 = vst [vmem:[%s1206_s3 + $0x100] sm:$0xff] %v375_v47 }
 0x123   :  { %434 = vst.msk [vmem:[%s1206_s3 + $0x38] sm:$0xff] %vm136_vm0, %v299_v49  ;;  %v302_v51 = vpop.f32.mrb[8].mxu0  ;;  %460 = vst.msk [vmem:[%s1206_s3 + $0x108] sm:$0xff] %vm136_vm0, %v377_v50  ;;  %v380_v52 = vpop.f32.mrb[8].mxu1 }
 0x124   :  { %v303_v53 = vadd.f32 %v302_v51, %v974_v17  ;;  %v304_v54 = vpop.f32.mrb[9].mxu0  ;;  %v381_v55 = vadd.f32 %v380_v52, %v974_v17  ;;  %v382_v56 = vpop.f32.mrb[9].mxu1 }
 0x125   :  { %v305_v57 = vadd.f32 %v304_v54, %v976_v18  ;;  %v383_v58 = vadd.f32 %v382_v56, %v976_v18 }
 0x126   :  { %435 = vst [vmem:[%s1206_s3 + $0x40] sm:$0xff] %v303_v53  ;;  %461 = vst [vmem:[%s1206_s3 + $0x110] sm:$0xff] %v381_v55 }
 0x127   :  { %436 = vst.msk [vmem:[%s1206_s3 + $0x48] sm:$0xff] %vm136_vm0, %v305_v57  ;;  %v308_v59 = vpop.f32.mrb[10].mxu0  ;;  %462 = vst.msk [vmem:[%s1206_s3 + $0x118] sm:$0xff] %vm136_vm0, %v383_v58  ;;  %v386_v60 = vpop.f32.mrb[10].mxu1 }
 0x128   :  { %v309_v61 = vadd.f32 %v308_v59, %v974_v17  ;;  %v310_v62 = vpop.f32.mrb[11].mxu0  ;;  %v387_v63 = vadd.f32 %v386_v60, %v974_v17  ;;  %v388_v0 = vpop.f32.mrb[11].mxu1 }
 0x129   :  { %v311_v1 = vadd.f32 %v310_v62, %v976_v18  ;;  %v389_v2 = vadd.f32 %v388_v0, %v976_v18 }
 0x12a   :  { %437 = vst [vmem:[%s1206_s3 + $0x50] sm:$0xff] %v309_v61  ;;  %463 = vst [vmem:[%s1206_s3 + $0x120] sm:$0xff] %v387_v63 }
 0x12b   :  { %438 = vst.msk [vmem:[%s1206_s3 + $0x58] sm:$0xff] %vm136_vm0, %v311_v1  ;;  %v314_v3 = vpop.f32.mrb[12].mxu0  ;;  %464 = vst.msk [vmem:[%s1206_s3 + $0x128] sm:$0xff] %vm136_vm0, %v389_v2  ;;  %v392_v4 = vpop.f32.mrb[12].mxu1 }
 0x12c   :  { %v315_v5 = vadd.f32 %v314_v3, %v974_v17  ;;  %v316_v6 = vpop.f32.mrb[13].mxu0  ;;  %v393_v7 = vadd.f32 %v392_v4, %v974_v17  ;;  %v394_v8 = vpop.f32.mrb[13].mxu1 }
 0x12d   :  { %v317_v9 = vadd.f32 %v316_v6, %v976_v18  ;;  %v395_v10 = vadd.f32 %v394_v8, %v976_v18 }
 0x12e   :  { %439 = vst [vmem:[%s1206_s3 + $0x60] sm:$0xff] %v315_v5  ;;  %465 = vst [vmem:[%s1206_s3 + $0x130] sm:$0xff] %v393_v7 }
 0x12f   :  { %440 = vst.msk [vmem:[%s1206_s3 + $0x68] sm:$0xff] %vm136_vm0, %v317_v9  ;;  %v320_v11 = vpop.f32.mrb[14].mxu0  ;;  %466 = vst.msk [vmem:[%s1206_s3 + $0x138] sm:$0xff] %vm136_vm0, %v395_v10  ;;  %v398_v12 = vpop.f32.mrb[14].mxu1 }
 0x130   :  { %v321_v13 = vadd.f32 %v320_v11, %v974_v17  ;;  %v322_v14 = vpop.f32.mrb[15].mxu0  ;;  %v399_v15 = vadd.f32 %v398_v12, %v974_v17  ;;  %v400_v16 = vpop.f32.mrb[15].mxu1 }
 0x131   :  { %v323_v19 = vadd.f32 %v322_v14, %v976_v18  ;;  %v401_v20 = vadd.f32 %v400_v16, %v976_v18 }
 0x132   :  { %441 = vst [vmem:[%s1206_s3 + $0x70] sm:$0xff] %v321_v13  ;;  %467 = vst [vmem:[%s1206_s3 + $0x140] sm:$0xff] %v399_v15 }
 0x133   :  { %442 = vst.msk [vmem:[%s1206_s3 + $0x78] sm:$0xff] %vm136_vm0, %v323_v19  ;;  %v326_v21 = vpop.f32.mrb[16].mxu0  ;;  %468 = vst.msk [vmem:[%s1206_s3 + $0x148] sm:$0xff] %vm136_vm0, %v401_v20  ;;  %v404_v22 = vpop.f32.mrb[16].mxu1 }
 0x134   :  { %v327_v23 = vadd.f32 %v326_v21, %v974_v17  ;;  %v328_v24 = vpop.f32.mrb[17].mxu0  ;;  %v405_v25 = vadd.f32 %v404_v22, %v974_v17  ;;  %v406_v26 = vpop.f32.mrb[17].mxu1 }
 0x135   :  { %v329_v27 = vadd.f32 %v328_v24, %v976_v18  ;;  %v407_v28 = vadd.f32 %v406_v26, %v976_v18 }
 0x136   :  { %443 = vst [vmem:[%s1206_s3 + $0x80] sm:$0xff] %v327_v23  ;;  %469 = vst [vmem:[%s1206_s3 + $0x150] sm:$0xff] %v405_v25 }
 0x137   :  { %444 = vst.msk [vmem:[%s1206_s3 + $0x88] sm:$0xff] %vm136_vm0, %v329_v27  ;;  %v332_v29 = vpop.f32.mrb[18].mxu0  ;;  %470 = vst.msk [vmem:[%s1206_s3 + $0x158] sm:$0xff] %vm136_vm0, %v407_v28  ;;  %v410_v30 = vpop.f32.mrb[18].mxu1 }
 0x138   :  { %v333_v31 = vadd.f32 %v332_v29, %v974_v17  ;;  %v334_v32 = vpop.f32.mrb[19].mxu0  ;;  %v411_v33 = vadd.f32 %v410_v30, %v974_v17  ;;  %v412_v34 = vpop.f32.mrb[19].mxu1 }
 0x139   :  { %v335_v35 = vadd.f32 %v334_v32, %v976_v18  ;;  %v413_v36 = vadd.f32 %v412_v34, %v976_v18 }
 0x13a   :  { %445 = vst [vmem:[%s1206_s3 + $0x90] sm:$0xff] %v333_v31  ;;  %471 = vst [vmem:[%s1206_s3 + $0x160] sm:$0xff] %v411_v33 }
 0x13b   :  { %446 = vst.msk [vmem:[%s1206_s3 + $0x98] sm:$0xff] %vm136_vm0, %v335_v35  ;;  %v338_v37 = vpop.f32.mrb[20].mxu0  ;;  %472 = vst.msk [vmem:[%s1206_s3 + $0x168] sm:$0xff] %vm136_vm0, %v413_v36  ;;  %v416_v38 = vpop.f32.mrb[20].mxu1 }
 0x13c   :  { %v339_v39 = vadd.f32 %v338_v37, %v974_v17  ;;  %v340_v40 = vpop.f32.mrb[21].mxu0  ;;  %v417_v41 = vadd.f32 %v416_v38, %v974_v17  ;;  %v418_v42 = vpop.f32.mrb[21].mxu1 }
 0x13d   :  { %v341_v43 = vadd.f32 %v340_v40, %v976_v18  ;;  %v419_v44 = vadd.f32 %v418_v42, %v976_v18 }
 0x13e   :  { %447 = vst [vmem:[%s1206_s3 + $0xa0] sm:$0xff] %v339_v39  ;;  %473 = vst [vmem:[%s1206_s3 + $0x170] sm:$0xff] %v417_v41 }
 0x13f   :  { %448 = vst.msk [vmem:[%s1206_s3 + $0xa8] sm:$0xff] %vm136_vm0, %v341_v43  ;;  %v344_v45 = vpop.f32.mrb[22].mxu0  ;;  %474 = vst.msk [vmem:[%s1206_s3 + $0x178] sm:$0xff] %vm136_vm0, %v419_v44  ;;  %v422_v46 = vpop.f32.mrb[22].mxu1 }
 0x140   :  { %v345_v47 = vadd.f32 %v344_v45, %v974_v17  ;;  %v346_v48 = vpop.f32.mrb[23].mxu0  ;;  %v423_v49 = vadd.f32 %v422_v46, %v974_v17  ;;  %v424_v50 = vpop.f32.mrb[23].mxu1 }
 0x141   :  { %v347_v51 = vadd.f32 %v346_v48, %v976_v18  ;;  %v425_v52 = vadd.f32 %v424_v50, %v976_v18 }
 0x142   :  { %449 = vst [vmem:[%s1206_s3 + $0xb0] sm:$0xff] %v345_v47  ;;  %475 = vst [vmem:[%s1206_s3 + $0x180] sm:$0xff] %v423_v49 }
 0x143   :  { %450 = vst.msk [vmem:[%s1206_s3 + $0xb8] sm:$0xff] %vm136_vm0, %v347_v51  ;;  %v350_v53 = vpop.f32.mrb[24].mxu0  ;;  %476 = vst.msk [vmem:[%s1206_s3 + $0x188] sm:$0xff] %vm136_vm0, %v425_v52 }
 0x144   :  { %v351_v54 = vadd.f32 %v350_v53, %v974_v17  ;;  %v352_v55 = vpop.f32.mrb[25].mxu0 }
 0x145   :  { %v353_v56 = vadd.f32 %v352_v55, %v976_v18 }
 0x146   :  { %451 = vst [vmem:[%s1206_s3 + $0xc0] sm:$0xff] %v351_v54 }
 0x147   :  { %452 = vst.msk [vmem:[%s1206_s3 + $0xc8] sm:$0xff] %vm136_vm0, %v353_v56 }

</bundles_post_ra>
